<compile_context>
chip_gen: v7x
topology: tpu7x:2x2x1
jax: 0.10.0
libtpu: 0.0.40
codegen_flags: <defaults>
</compile_context>

<pallas_src>
import functools

import jax
import jax.numpy as jnp
from jax.experimental import pallas as pl
from jax.experimental.pallas import tpu as pltpu


# ----------------------------- sizing helpers ------------------------------ #

_SINGLE_BUFFER_BYTES = 2 * 1024 * 1024   # resident weights above this are single-buffered
_NEG_INF = -1e30                         # finite "-inf" for online-softmax init


def _round_up(x, m):
    return -(-x // m) * m


def _vmem_limit_bytes():
    """~75% of this generation's physical VMEM (v5e/v6e: 128 MiB -> 96 MiB,
    v7x: 64 MiB -> 48 MiB).  Falls back to the conservative v7x figure."""
    cap = 0
    try:
        info = pltpu.get_tpu_info()
        cap = int(getattr(info, "vmem_capacity_bytes", 0) or 0)
    except Exception:
        cap = 0
    if cap <= 0:
        cap = 64 * 1024 * 1024
    return min((cap * 3) // 4, 127 * 1024 * 1024)


def _row_tiling(n, d, vmem_limit):
    """Row tile (multiple of 8) + padded row count for the projection stages."""
    # double-buffered per-row VMEM: stage-1 (bf16 x + bf16 qkv) vs stage-3
    # (bf16 ctx + f32 residual + f32 out + f32 accumulator scratch)
    per_row = max(2 * (2 * d + 6 * d), 2 * (2 * d + 4 * d + 4 * d) + 4 * d)
    budget = vmem_limit // 2
    target = 1024 if vmem_limit >= (80 << 20) else 512
    tr = min(target, _round_up(n, 8))
    while tr > 8 and tr * per_row > budget:
        tr //= 2
    tr = max(8, tr - tr % 8)
    # v7x megacore: keep >= 2 grid steps for large problems so the "parallel"
    # row axis can shard across both TensorCores (near-free on v5e/v6e).
    if _round_up(n, tr) // tr < 2 and tr >= 256:
        tr = max(8, (tr // 2) - (tr // 2) % 8)
    return tr, _round_up(n, tr)


def _seq_tile(s, target):
    """Largest multiple-of-8 divisor of s that is <= target (else s itself)."""
    if s <= target:
        return s
    t = (target // 8) * 8
    while t >= 8:
        if s % t == 0:
            return t
        t -= 8
    return s


def _head_tiling(bh, dh, tq, tk, vmem_limit):
    """VMEM-aware batch*head tile for the flash-attention stage."""
    per_head = (12 * tq * dh          # q/out blocks (bf16, double-buf) + f32 acc scratch
                + 8 * tk * dh         # k/v blocks (bf16, double-buf)
                + 12 * tq * tk        # live f32 score/prob temporaries (~3 copies)
                + 8 * tq)             # m/l scratch
    budget = vmem_limit // 2
    tb = max(1, min(bh, 16, budget // per_head))
    # >= 2 grid steps (v7x megacore) while keeping >= 2 heads/step so exp (EUP)
    # of one head can overlap QK^T (MXU) of the next on v6e/v7x.
    if _round_up(bh, tb) // tb < 2 and tb >= 4:
        tb //= 2
    return tb, _round_up(bh, tb)


def _col_tile(cols, rows, budget):
    """Output-column tile for a (rows, cols) bf16 weight: full width when the
    double-buffered weight fits, else the largest multiple-of-128 divisor."""
    if 2 * rows * cols * 2 <= budget:
        return cols
    t = (min(cols, budget // (4 * rows)) // 128) * 128
    while t >= 128:
        if cols % t == 0:
            return t
        t -= 128
    return cols          # fall back to resident (single-buffer path handles it)


def _contraction_tile(d, budget):
    """Contraction tile for the (d, d) bf16 out-proj weight; must be a multiple
    of 128 because it is also the lane width of the ctx input block."""
    if 2 * d * d * 2 <= budget:
        return d
    t = (min(d, budget // (4 * d)) // 128) * 128
    while t >= 128:
        if d % t == 0:
            return t
        t -= 128
    return d


def _pad_rows(a, n_pad):
    n = a.shape[0]
    if n_pad == n:
        return a
    return jnp.pad(a, ((0, n_pad - n), (0, 0)))


# ----------------------------- kernels ------------------------------------ #

def _qkv_kernel(x_ref, w_ref, b_ref, o_ref):
    # x: (TR, D) bf16, w: (D, TC) bf16 (pre-transposed, softmax scale folded
    # into the Q columns), b: (1, TC) f32.  bf16 operands, f32 MXU accumulate.
    acc = jnp.dot(x_ref[...], w_ref[...], preferred_element_type=jnp.float32)
    o_ref[...] = (acc + b_ref[...]).astype(o_ref.dtype)


def _flash_attn_kernel(q_ref, k_ref, v_ref, o_ref, m_sc, l_sc, acc_sc):
    # Online-softmax attention over KV blocks: grid = (head tiles, q tiles,
    # kv tiles); accumulators live in VMEM scratch so VMEM is O(tb*tq*tk)
    # instead of O(tb*S^2).  q already carries the 1/sqrt(dh) scale; softmax
    # math stays f32 (v5e has no bf16 VPU/EUP).
    ki = pl.program_id(2)

    @pl.when(ki == 0)
    def _():
        m_sc[...] = jnp.full(m_sc.shape, _NEG_INF, dtype=m_sc.dtype)
        l_sc[...] = jnp.zeros(l_sc.shape, dtype=l_sc.dtype)
        acc_sc[...] = jnp.zeros(acc_sc.shape, dtype=acc_sc.dtype)

    s = jnp.einsum("bqd,bkd->bqk", q_ref[...], k_ref[...],
                   preferred_element_type=jnp.float32)
    m_prev = m_sc[...]
    m_new = jnp.maximum(m_prev, jnp.max(s, axis=-1, keepdims=True))
    alpha = jnp.exp(m_prev - m_new)
    p = jnp.exp(s - m_new)                        # unnormalized probabilities
    l_sc[...] = alpha * l_sc[...] + jnp.sum(p, axis=-1, keepdims=True)
    acc_sc[...] = alpha * acc_sc[...] + jnp.einsum(
        "bqk,bkd->bqd", p.astype(v_ref.dtype), v_ref[...],
        preferred_element_type=jnp.float32)
    m_sc[...] = m_new

    @pl.when(ki == pl.num_programs(2) - 1)
    def _():
        # Normalize AFTER the PV matmul: tb*tq*dh multiplies instead of
        # tb*tq*tk on the score matrix; reciprocal runs on the EUP slot.
        o_ref[...] = (acc_sc[...] * pl.reciprocal(l_sc[...], approx=True)
                      ).astype(o_ref.dtype)


def _out_ln_kernel(ctx_ref, x_ref, w_ref, b_ref, g_ref, beta_ref, o_ref,
                   acc_ref, *, eps):
    # fc(context) (contraction-tiled) -> dropout (eval-mode identity) ->
    # residual add -> LayerNorm, fused; f32 accumulation and LN math.
    # TODO(synk): nn.Dropout training-mode RNG masking (pltpu.prng_*) not
    # implemented; eval-mode identity only.
    kk = pl.program_id(1)

    @pl.when(kk == 0)
    def _():
        acc_ref[...] = jnp.zeros(acc_ref.shape, dtype=acc_ref.dtype)

    acc_ref[...] += jnp.dot(ctx_ref[...], w_ref[...],
                            preferred_element_type=jnp.float32)

    @pl.when(kk == pl.num_programs(1) - 1)
    def _():
        out = acc_ref[...] + b_ref[...] + x_ref[...]        # f32 residual
        mean = jnp.mean(out, axis=-1, keepdims=True)
        cent = out - mean
        var = jnp.mean(cent * cent, axis=-1, keepdims=True)
        norm = cent * jax.lax.rsqrt(var + eps)
        o_ref[...] = (norm * g_ref[...] + beta_ref[...]).astype(o_ref.dtype)


# ----------------------------- module wrapper ------------------------------ #

def multi_head_attention(x, params, num_head, eps=1e-5):
    b, s, d = x.shape
    assert d % num_head == 0
    dh = d // num_head
    n = b * s
    bh = b * num_head
    scale = dh ** (-0.5)

    vmem_limit = _vmem_limit_bytes()

    x2d = x.reshape(n, d).astype(jnp.float32)
    x2d_bf16 = x2d.astype(jnp.bfloat16)          # halves the stage-1 HBM read

    # ---- one-time weight prep (outside the hot path) ----
    # Fold the attention scale into the Q projection (mathematically identical
    # to scaling the score matrix, but costs nothing at runtime).
    wqkv_t = jnp.concatenate(
        [params["wq"].T * scale, params["wk"].T, params["wv"].T], axis=1
    ).astype(jnp.bfloat16)                                   # (D, 3D)
    bqkv = jnp.concatenate(
        [params["bq"] * scale, params["bk"], params["bv"]]
    ).reshape(1, 3 * d).astype(jnp.float32)                  # (1, 3D)
    wo_t = params["wo"].T.astype(jnp.bfloat16)               # (D, D)
    bo = params["bo"].reshape(1, d).astype(jnp.float32)
    gamma = params["gamma"].reshape(1, d).astype(jnp.float32)
    beta = params["beta"].reshape(1, d).astype(jnp.float32)

    tr, n_pad = _row_tiling(n, d, vmem_limit)
    x1 = _pad_rows(x2d_bf16, n_pad)

    # ---- 1) fused QKV projection: rows x (optional) output-column tiling ----
    tc1 = _col_tile(3 * d, d, vmem_limit // 2)
    n_col = (3 * d) // tc1
    if n_col == 1 and d * 3 * d * 2 >= _SINGLE_BUFFER_BYTES:
        # large resident weight: do not double-buffer it
        w1_spec = pl.BlockSpec((d, 3 * d), lambda i, j: (0, 0),
                               pipeline_mode=pl.Buffered(buffer_count=1))
    else:
        w1_spec = pl.BlockSpec((d, tc1), lambda i, j: (0, j))

    qkv = pl.pallas_call(
        _qkv_kernel,
        out_shape=jax.ShapeDtypeStruct((n_pad, 3 * d), jnp.bfloat16),
        grid=(n_pad // tr, n_col),
        in_specs=[
            pl.BlockSpec((tr, d), lambda i, j: (i, 0)),
            w1_spec,
            pl.BlockSpec((1, tc1), lambda i, j: (0, j)),
        ],
        out_specs=pl.BlockSpec((tr, tc1), lambda i, j: (i, j)),
        compiler_params=pltpu.CompilerParams(
            dimension_semantics=("parallel", "parallel"),
            vmem_limit_bytes=vmem_limit),
        cost_estimate=pl.CostEstimate(
            flops=2 * n * d * 3 * d, transcendentals=0,
            bytes_accessed=n * d * 2 + d * 3 * d * 2 + n * 3 * d * 2),
    )(x1, wqkv_t, bqkv)
    qkv = qkv[:n]

    # Contiguous views matching torch .view(batch*num_head, -1, dim_head)
    # (a raw view, NOT a per-head transpose split -- matches the module).
    q3 = qkv[:, :d].reshape(bh, s, dh)
    k3 = qkv[:, d:2 * d].reshape(bh, s, dh)
    v3 = qkv[:, 2 * d:].reshape(bh, s, dh)

    # ---- 2) flash-style attention: (head, q, kv) grid, online softmax ----
    tq = _seq_tile(s, 256)
    tk = _seq_tile(s, 512)
    tb, bh_pad = _head_tiling(bh, dh, tq, tk, vmem_limit)
    if bh_pad != bh:
        padw = ((0, bh_pad - bh), (0, 0), (0, 0))
        q3 = jnp.pad(q3, padw)
        k3 = jnp.pad(k3, padw)
        v3 = jnp.pad(v3, padw)

    q_spec = pl.BlockSpec((tb, tq, dh), lambda h, qi, ki: (h, qi, 0))
    kv_spec = pl.BlockSpec((tb, tk, dh), lambda h, qi, ki: (h, ki, 0))
    # TODO(synk): for dh < 128 the (tb, tq, dh) output block produces masked
    # vst.msk stores; a lane-dense multi-head output slab would avoid that.
    ctx3 = pl.pallas_call(
        _flash_attn_kernel,
        out_shape=jax.ShapeDtypeStruct((bh_pad, s, dh), jnp.bfloat16),
        grid=(bh_pad // tb, s // tq, s // tk),
        in_specs=[q_spec, kv_spec, kv_spec],
        out_specs=pl.BlockSpec((tb, tq, dh), lambda h, qi, ki: (h, qi, 0)),
        scratch_shapes=[pltpu.VMEM((tb, tq, 1), jnp.float32),
                        pltpu.VMEM((tb, tq, 1), jnp.float32),
                        pltpu.VMEM((tb, tq, dh), jnp.float32)],
        compiler_params=pltpu.CompilerParams(
            dimension_semantics=("parallel", "parallel", "arbitrary"),
            vmem_limit_bytes=vmem_limit),
        cost_estimate=pl.CostEstimate(
            flops=4 * bh * s * s * dh, transcendentals=bh * s * s,
            bytes_accessed=4 * bh * s * dh * 2),
    )(q3, k3, v3)

    # torch .view(batch, -1, dim_head * num_head) -> flat (N, D)
    ctx2d = ctx3[:bh].reshape(n, d)

    # ---- 3) out-proj (contraction-tiled) + residual + LayerNorm ----
    tk3 = _contraction_tile(d, vmem_limit // 2)
    n_k = d // tk3
    if n_k == 1 and d * d * 2 >= _SINGLE_BUFFER_BYTES:
        w3_spec = pl.BlockSpec((d, d), lambda i, k: (0, 0),
                               pipeline_mode=pl.Buffered(buffer_count=1))
    else:
        w3_spec = pl.BlockSpec((tk3, d), lambda i, k: (k, 0))

    ctx_p = _pad_rows(ctx2d, n_pad)
    x3 = _pad_rows(x2d, n_pad)                    # f32 residual path

    out2d = pl.pallas_call(
        functools.partial(_out_ln_kernel, eps=eps),
        out_shape=jax.ShapeDtypeStruct((n_pad, d), jnp.float32),
        grid=(n_pad // tr, n_k),
        in_specs=[
            pl.BlockSpec((tr, tk3), lambda i, k: (i, k)),    # ctx (bf16)
            pl.BlockSpec((tr, d), lambda i, k: (i, 0)),      # residual x (f32)
            w3_spec,
            pl.BlockSpec((1, d), lambda i, k: (0, 0)),
            pl.BlockSpec((1, d), lambda i, k: (0, 0)),
            pl.BlockSpec((1, d), lambda i, k: (0, 0)),
        ],
        out_specs=pl.BlockSpec((tr, d), lambda i, k: (i, 0)),
        scratch_shapes=[pltpu.VMEM((tr, d), jnp.float32)],
        compiler_params=pltpu.CompilerParams(
            dimension_semantics=("parallel", "arbitrary"),
            vmem_limit_bytes=vmem_limit),
        cost_estimate=pl.CostEstimate(
            flops=2 * n * d * d + 10 * n * d, transcendentals=n,
            bytes_accessed=n * d * 2 + n * d * 4 + d * d * 2 + n * d * 4),
    )(ctx_p, x3, wo_t, bo, gamma, beta)

    return out2d[:n].reshape(b, s, d)


# ----------------------------- reference (pure JAX) ------------------------ #

def reference(x, params, num_head):
    b, s, d = x.shape
    dh = d // num_head
    q = x @ params["wq"].T + params["bq"]
    k = x @ params["wk"].T + params["bk"]
    v = x @ params["wv"].T + params["bv"]
    q = q.reshape(b * num_head, s, dh)
    k = k.reshape(b * num_head, s, dh)
    v = v.reshape(b * num_head, s, dh)
    scale = dh ** (-0.5)
    att = jnp.einsum("nqd,nkd->nqk", q, k) * scale
    att = jax.nn.softmax(att, axis=-1)
    ctx = jnp.einsum("nqk,nkd->nqd", att, v).reshape(b, s, d)
    out = ctx @ params["wo"].T + params["bo"]
    out = out + x
    mean = jnp.mean(out, axis=-1, keepdims=True)
    var = jnp.mean((out - mean) ** 2, axis=-1, keepdims=True)
    out = (out - mean) / jnp.sqrt(var + 1e-5)
    return out * params["gamma"] + params["beta"]


# ----------------------------- main ---------------------------------------- #

if __name__ == "__main__":
    batch, seq, dim_model, num_head = 2, 8, 32, 4

    key = jax.random.PRNGKey(0)
    k_x, k_q, k_k, k_v, k_o, k_bq, k_bk, k_bv, k_bo = jax.random.split(key, 9)

    scale_init = 0.02
    params = {
        "wq": scale_init * jax.random.normal(k_q, (dim_model, dim_model), jnp.float32),
        "wk": scale_init * jax.random.normal(k_k, (dim_model, dim_model), jnp.float32),
        "wv": scale_init * jax.random.normal(k_v, (dim_model, dim_model), jnp.float32),
        "wo": scale_init * jax.random.normal(k_o, (dim_model, dim_model), jnp.float32),
        "bq": scale_init * jax.random.normal(k_bq, (dim_model,), jnp.float32),
        "bk": scale_init * jax.random.normal(k_bk, (dim_model,), jnp.float32),
        "bv": scale_init * jax.random.normal(k_bv, (dim_model,), jnp.float32),
        "bo": scale_init * jax.random.normal(k_bo, (dim_model,), jnp.float32),
        # nn.LayerNorm default init: weight=1, bias=0
        "gamma": jnp.ones((dim_model,), jnp.float32),
        "beta": jnp.zeros((dim_model,), jnp.float32),
    }

    x = jax.random.normal(k_x, (batch, seq, dim_model), jnp.float32)

    out = multi_head_attention(x, params, num_head)
    out = jax.block_until_ready(out)

    ref = reference(x, params, num_head)
    assert out.shape == (batch, seq, dim_model)
    max_err = float(jnp.max(jnp.abs(out - ref)))
    # bf16 matmul operands/inputs + approx reciprocal -> looser tolerance than f32
    assert max_err < 1e-2, f"max abs err {max_err}"

    print("KERNEL_OK")
</pallas_src>

<mosaic_0001>
module attributes {stable_mosaic.version = 11 : i64} {
  func.func @_qkv_kernel(%arg0: i32, %arg1: i32, %arg2: memref<16x32xbf16, #tpu.memory_space<vmem>>, %arg3: memref<32x96xbf16, #tpu.memory_space<vmem>>, %arg4: memref<1x96xf32, #tpu.memory_space<vmem>>, %arg5: memref<16x96xbf16, #tpu.memory_space<vmem>>) attributes {dimension_semantics = [#tpu.dimension_semantics<parallel>, #tpu.dimension_semantics<parallel>], iteration_bounds = array<i64: 1, 1>, scalar_prefetch = 0 : i64, scratch_operands = 0 : i64, tpu.core_type = #tpu.core_type<tc>, window_params = [{transform_indices = @transform_0, window_bounds = array<i64: 16, 32>}, {transform_indices = @transform_1, window_bounds = array<i64: 32, 96>}, {transform_indices = @transform_2, window_bounds = array<i64: 1, 96>}, {transform_indices = @transform_3, window_bounds = array<i64: 16, 96>}]} {
    %c0 = arith.constant 0 : index
    %c0_0 = arith.constant 0 : index
    %0 = vector.load %arg2[%c0, %c0_0] : memref<16x32xbf16, #tpu.memory_space<vmem>>, vector<16x32xbf16>
    %c0_1 = arith.constant 0 : index
    %c0_2 = arith.constant 0 : index
    %1 = vector.load %arg3[%c0_1, %c0_2] : memref<32x96xbf16, #tpu.memory_space<vmem>>, vector<32x96xbf16>
    %cst = arith.constant dense<0.000000e+00> : vector<16x96xf32>
    %2 = tpu.matmul %0, %1, %cst {dimension_numbers = #tpu.dot_dimension_numbers<[1], [0], [0], [1], [0, 0, 1, 1], [], []>} : vector<16x32xbf16>, vector<32x96xbf16>, vector<16x96xf32> -> vector<16x96xf32>
    %c0_3 = arith.constant 0 : index
    %c0_4 = arith.constant 0 : index
    %3 = vector.load %arg4[%c0_3, %c0_4] : memref<1x96xf32, #tpu.memory_space<vmem>>, vector<1x96xf32>
    %4 = vector.broadcast %3 : vector<1x96xf32> to vector<16x96xf32>
    %5 = arith.addf %2, %4 : vector<16x96xf32>
    %6 = arith.truncf %5 : vector<16x96xf32> to vector<16x96xbf16>
    %c0_5 = arith.constant 0 : index
    %c0_6 = arith.constant 0 : index
    %7 = vector.load %arg5[%c0_5, %c0_6] : memref<16x96xbf16, #tpu.memory_space<vmem>>, vector<16x96xbf16>
    tpu.vector_store %arg5[%c0_5, %c0_6], %6 {strides = array<i32>} : memref<16x96xbf16, #tpu.memory_space<vmem>>, vector<16x96xbf16>,
    return
  }
  func.func @transform_0(%arg0: i32, %arg1: i32) -> (i32, i32) {
    %c0_i32 = arith.constant 0 : i32
    %c0_i32_0 = arith.constant 0 : i32
    return %arg0, %c0_i32 : i32, i32
  }
  func.func @transform_1(%arg0: i32, %arg1: i32) -> (i32, i32) {
    %c0_i32 = arith.constant 0 : i32
    %c0_i32_0 = arith.constant 0 : i32
    return %c0_i32, %arg1 : i32, i32
  }
  func.func @transform_2(%arg0: i32, %arg1: i32) -> (i32, i32) {
    %c0_i32 = arith.constant 0 : i32
    %c0_i32_0 = arith.constant 0 : i32
    return %c0_i32, %arg1 : i32, i32
  }
  func.func @transform_3(%arg0: i32, %arg1: i32) -> (i32, i32) {
    %c0_i32 = arith.constant 0 : i32
    return %arg0, %arg1 : i32, i32
  }
}

</mosaic_0001>

<bundles_post_ra>
// kernel: tpu_custom_call.1
= control target key start
LH: loop header
LB: loop body
LE: loop exit
PB: predicated region body
PF: predicated region fallthrough
CT: control target
= control target key end

     0   :  { %8 = vsyncpa [#allocation3], 0  ;;  %s325_s0 = inlined_call_operand.hbm [shape: bf16[16,32], index: 0, kind: input, shape index: {}]   ;;  %s326_s1 = inlined_call_operand.hbm [shape: bf16[32,96], index: 1, kind: input, shape index: {}]   ;;  %s327_s2 = inlined_call_operand.vmem [shape: f32[1,96], index: 2, kind: input, shape index: {}]   ;;  %s328_s3 = inlined_call_operand.hbm [shape: bf16[16,96], index: 3, kind: output, shape index: {}]  }
   0x1   :  { %9 = vsyncpa [#allocation6], 0 }
   0x2   :  { %10 = vsyncpa [#allocation4], 0  ;;  %s250_s12 = smov [#allocation2]   ;;  %s178_s16 = scalar_lea.hbm %s325_s0, 128 }
   0x3   :  { %s16_s13 = sshll.u32 %s250_s12, 4  ;;  %p179_p0 = scmp.ne.s32.totalorder %s325_s0, %s178_s16  ;;  %s17_s13 = int_to_ptr.vmem [resolvable:$true] %s16_s13 }
   0x4   :  { %p182_p1 = scmp.lt.u32.totalorder %s178_s16, %s325_s0 }
   0x6   :  { %p184_p2 = pnand %p182_p1, %p179_p0 }
   0x8   :  { %187 = shalt.err (!%p184_p2)
}
   0x9   :  { %s188_s21 = scalar_lea.vmem %s17_s13, 128  ;;  %p193_p4 = scmp.lt.s32.totalorder %s17_s13, %s17_s13 }
   0xa   :  { %p189_p3 = scmp.ne.s32.totalorder %s17_s13, %s188_s21  ;;  %p194_p5 = scmp.lt.s32.totalorder %s188_s21, %s188_s21 }
   0xc   :  { %p195_p6 = por %p194_p5, %p193_p4 }
   0xe   :  { %p196_p7 = pnand %p195_p6, %p189_p3 }
  0x10   :  { %199 = shalt.err (!%p196_p7)
}
  0x11   :  { %s251_s22 = smov 64   ;;  %s252_s23 = smov 4  }
  0x12   :  { %22 = dma.hbm_to_vmem [thread:$0]  %s325_s0, 128, %s17_s13, [#allocation3], %s251_s22, %s251_s22, %s252_s23  }
  0x13   :  { %s253_s26 = smov [#allocation5]   ;;  %s200_s30 = scalar_lea.hbm %s326_s1, 256 }
  0x14   :  { %s28_s27 = sshll.u32 %s253_s26, 4  ;;  %p201_p8 = scmp.ne.s32.totalorder %s326_s1, %s200_s30  ;;  %s29_s27 = int_to_ptr.vmem [resolvable:$true] %s28_s27 }
  0x15   :  { %p204_p9 = scmp.lt.u32.totalorder %s200_s30, %s326_s1 }
  0x17   :  { %p206_p10 = pnand %p204_p9, %p201_p8 }
  0x19   :  { %209 = shalt.err (!%p206_p10)
}
  0x1a   :  { %s210_s8 = scalar_lea.vmem %s29_s27, 256  ;;  %p215_p12 = scmp.lt.s32.totalorder %s29_s27, %s29_s27 }
  0x1b   :  { %p211_p11 = scmp.ne.s32.totalorder %s29_s27, %s210_s8  ;;  %p216_p13 = scmp.lt.s32.totalorder %s210_s8, %s210_s8 }
  0x1d   :  { %p217_p0 = por %p216_p13, %p215_p12 }
  0x1f   :  { %p218_p1 = pnand %p217_p0, %p211_p11 }
  0x21   :  { %221 = shalt.err (!%p218_p1)
}
  0x22   :  { %34 = dma.hbm_to_vmem [thread:$0]  %s326_s1, 256, %s29_s27, [#allocation6], %s251_s22, %s251_s22, %s252_s23  }
  0x23   :  { %244 = dma.done.wait [#allocation3], 128  }
  0x24   :  { %245 = vsyncadd [#allocation3], 4294967168 }
  0x25   :  { %246 = dma.done.wait [#allocation6], 256  }
  0x26   :  { %247 = vsyncadd [#allocation6], 4294967040  ;;  %v254_v0 = vmov 0.0   ;;  %vm255_vm0 = vmmov 0   ;;  %v175_v1 = vld [vmem:[#allocation5] sm:$0xff]   ;;  %v176_v2 = vld [vmem:[#allocation5 + $0x8] sm:$0xff]  }
  0x27   :  { %160 = vmatprep.subr.bf16.mxu0 %v254_v0  ;;  %164 = vmatprep.mubr.msk.bf16.mxu0 %vm255_vm0, %v254_v0  ;;  %v177_v3 = vld [vmem:[#allocation2] sm:$0xff]   ;;  %vm74_vm1 = vcmask 261120   ;;  %vm127_vm2 = vcmask 781312   ;;  %s256_s1 = smov [#allocation7]  }
  0x28   :  { %161 = vmatpush3.bf16.msra.mxu0 %v175_v1  ;;  %v148_v4 = vld [vmem:[%s327_s2] ss:$0 sm:$0xff]  ;;  %s135_s12 = sshll.u32 %s256_s1, 4  ;;  %s136_s12 = int_to_ptr.vmem [resolvable:$true] %s135_s12 }
  0x29   :  { %162 = vmatprep.subr.bf16.mxu0 %v254_v0  ;;  %s222_s13 = scalar_lea.vmem %s136_s12, 128  ;;  %p227_p3 = scmp.lt.s32.totalorder %s136_s12, %s136_s12 }
  0x2a   :  { %p223_p2 = scmp.ne.s32.totalorder %s136_s12, %s222_s13  ;;  %p228_p4 = scmp.lt.s32.totalorder %s222_s13, %s222_s13 }
  0x2c   :  { %163 = vmatpush3.bf16.msra.mxu0 %v176_v2  ;;  %p229_p5 = por %p228_p4, %p227_p3 }
  0x2e   :  { %p230_p6 = pnand %p229_p5, %p223_p2 }
  0x2f   :  { %165 = vmatmul.mubr.msk.bf16.vlgmr.msra.gmra.mrb[0].mxu0 %vm74_vm1, %v177_v3 }
 0x102   :  { %v112_v5 = vpop.f32.mrb[0].mxu0 }
 0x103   :  { %v113_v6 = vadd.f32 %v148_v4, %v112_v5  ;;  %v166_v7 = vpop.f32.mrb[1].mxu0 }
 0x104   :  { %v115_v8 = vpop.f32.mrb[2].mxu0 }
 0x105   :  { %v155_v9 = vpack.c.bf16 %v113_v6, %v113_v6  ;;  %v116_v10 = vadd.f32 %v148_v4, %v115_v8  ;;  %v167_v11 = vpop.f32.mrb[3].mxu0 }
 0x107   :  { %v156_v12 = vpack.c.bf16 %v116_v10, %v116_v10  ;;  %128 = vst.msk [vmem:[#allocation7] sm:$0xf] %vm127_vm2, %v155_v9 }
 0x109   :  { %129 = vst.msk [vmem:[#allocation7 + $0x4] sm:$0xf] %vm127_vm2, %v156_v12 }
 0x10a   :  { %233 = shalt.err (!%p230_p6)
}
 0x10b   :  { %s234_s15 = scalar_lea.hbm %s328_s3, 128 }
 0x10c   :  { %p235_p7 = scmp.ne.s32.totalorder %s328_s3, %s234_s15  ;;  %p238_p8 = scmp.lt.u32.totalorder %s234_s15, %s328_s3 }
 0x10e   :  { %p240_p9 = pnand %p238_p8, %p235_p7 }
 0x110   :  { %243 = shalt.err (!%p240_p9)
}
 0x111   :  { %141 = dma.vmem_to_hbm [thread:$0]  %s136_s12, 128, %s328_s3, [#allocation4], %s251_s22, %s251_s22, %s252_s23  }
 0x112   :  { %248 = dma.done.wait [#allocation4], 128  }
 0x113   :  { %249 = vsyncadd [#allocation4], 4294967168 }
 0x114   :  { %145 = vsyncpa [#allocation3], 1 }
 0x115   :  { %146 = vsyncpa [#allocation6], 1 }
 0x116   :  { %147 = vsyncpa [#allocation4], 1 }

</bundles_post_ra>
